<compile_context>
chip_gen: v6e
topology: v6e:2x2x1
jax: 0.10.0
libtpu: 0.0.40
codegen_flags: <defaults>
</compile_context>

<pallas_src>
import jax
import jax.numpy as jnp
from jax.experimental import pallas as pl
from jax.experimental.pallas import tpu as pltpu

N_TRUE = 10                      # problem dimension (x0 head + 9 quartic coords)
_LANE_MIN = 128                  # lane alignment
_LANE_BLOCK_TARGET = 64 * 1024   # lanes per grid step


def _round_up(n, m):
    return ((n + m - 1) // m) * m


def _exp10_kernel(x_ref, o_ref):
    """x_ref: (10, LB) f32 SoA block; o_ref: (1, LB) lane-dense output slab.

    Lane j holds one evaluation point:
      f = tanh(x0/2) + 0.1*exp(-x0) + sum_{i=1..9} (x_i - 1)^4
    (tanh(x0/2) == (e^x0 - 1)/(e^x0 + 1), overflow-safe for large x0).
    """
    x = x_ref[...]                                   # (10, LB) f32
    x0 = x[0:1, :]                                   # head only on sublane 0
    head = jnp.tanh(0.5 * x0) + 0.1 * jnp.exp(-x0)   # (1, LB)
    d = x[1:, :] - 1.0                               # (9, LB)
    d2 = d * d
    o_ref[...] = head + jnp.sum(d2 * d2, axis=0, keepdims=True)


def _choose_lane_block(b_pad):
    """Pick a 128-aligned lane block; keep >= 2 grid steps for v7x when possible."""
    lane_block = min(_LANE_BLOCK_TARGET, b_pad)
    if b_pad >= 2 * _LANE_MIN and pl.cdiv(b_pad, lane_block) < 2:
        lane_block = _round_up(pl.cdiv(b_pad, 2), _LANE_MIN)
    return lane_block


def exponential10_soa(xs_t: jax.Array) -> jax.Array:
    """xs_t: (10, B) f32 (structure-of-arrays). Returns (B,) with f per column."""
    n, b = xs_t.shape
    assert n == N_TRUE
    xs_t = xs_t.astype(jnp.float32)

    # Pad lanes only to the minimal 128 alignment (padded columns are finite and
    # sliced off below); non-dividing trailing blocks are left to the cdiv grid.
    b_pad = _round_up(max(b, 1), _LANE_MIN)
    if b_pad != b:
        xs_t = jnp.pad(xs_t, ((0, 0), (0, b_pad - b)))

    lane_block = _choose_lane_block(b_pad)
    grid = (pl.cdiv(b_pad, lane_block),)

    out = pl.pallas_call(
        _exp10_kernel,
        out_shape=jax.ShapeDtypeStruct((1, b_pad), jnp.float32),
        grid=grid,
        in_specs=[pl.BlockSpec((N_TRUE, lane_block), lambda i: (0, i))],
        out_specs=pl.BlockSpec((1, lane_block), lambda i: (0, i)),
        compiler_params=pltpu.CompilerParams(
            dimension_semantics=("parallel",),        # v7x: both TCs split the batch
            vmem_limit_bytes=32 * 1024 * 1024,        # fits v7x, lifts v5e default
        ),
    )(xs_t)
    return out[0, :b]


def exponential10_batch(xs: jax.Array) -> jax.Array:
    """xs: (B, 10) -> (B,). Thin wrapper: transpose to the lane-dense SoA layout."""
    assert xs.shape[-1] == N_TRUE
    return exponential10_soa(xs.astype(jnp.float32).T)


def exponential10(x: jax.Array) -> jax.Array:
    """x: (10,) -> scalar f(x) (the literal nn.Module forward), via the same kernel."""
    assert x.shape == (N_TRUE,)
    return exponential10_soa(x.astype(jnp.float32).reshape(N_TRUE, 1))[0]


def _reference(x: jax.Array) -> jax.Array:
    x = x.astype(jnp.float32)
    x0 = x[0]
    term1 = (jnp.exp(x0) - 1.0) / (jnp.exp(x0) + 1.0)
    term2 = 0.1 * jnp.exp(-x0)
    rest = jnp.sum((x[1:] - 1.0) ** 4)
    return term1 + term2 + rest


if __name__ == "__main__":
    key = jax.random.PRNGKey(0)
    k_single, k_batch = jax.random.split(key)

    # Single 10-d evaluation (matches the nn.Module forward exactly).
    x = jax.random.normal(k_single, (N_TRUE,), dtype=jnp.float32)
    y = jax.block_until_ready(exponential10(x))
    y_ref = _reference(x)
    assert jnp.allclose(y, y_ref, rtol=1e-5, atol=1e-5), (y, y_ref)

    # Batched evaluation (500 points -> exercises 128-lane padding + a 2-step grid).
    B = 500
    xs = jax.random.normal(k_batch, (B, N_TRUE), dtype=jnp.float32)
    ys = jax.block_until_ready(exponential10_batch(xs))
    ys_ref = jax.vmap(_reference)(xs)
    assert jnp.allclose(ys, ys_ref, rtol=1e-5, atol=1e-5), (ys, ys_ref)

    print("KERNEL_OK")
</pallas_src>

<mosaic_0001>
module attributes {stable_mosaic.version = 11 : i64} {
  func.func @_exp10_kernel(%arg0: i32, %arg1: memref<10x128xf32, #tpu.memory_space<vmem>>, %arg2: memref<1x128xf32, #tpu.memory_space<vmem>>) attributes {dimension_semantics = [#tpu.dimension_semantics<parallel>], iteration_bounds = array<i64: 1>, scalar_prefetch = 0 : i64, scratch_operands = 0 : i64, tpu.core_type = #tpu.core_type<tc>, window_params = [{transform_indices = @transform_0, window_bounds = array<i64: 10, 128>}, {transform_indices = @transform_1, window_bounds = array<i64: 1, 128>}]} {
    %c0 = arith.constant 0 : index
    %c0_0 = arith.constant 0 : index
    %0 = vector.load %arg1[%c0, %c0_0] : memref<10x128xf32, #tpu.memory_space<vmem>>, vector<10x128xf32>
    %1 = vector.extract_strided_slice %0 {offsets = [0, 0], sizes = [1, 128], strides = [1, 1]} : vector<10x128xf32> to vector<1x128xf32>
    %cst = arith.constant 5.000000e-01 : f32
    %2 = vector.broadcast %cst : f32 to vector<1x128xf32>
    %3 = arith.mulf %2, %1 : vector<1x128xf32>
    %4 = math.tanh %3 : vector<1x128xf32>
    %cst_1 = arith.constant 0.000000e+00 : f32
    %5 = vector.broadcast %cst_1 : f32 to vector<1x128xf32>
    %6 = arith.subf %5, %1 : vector<1x128xf32>
    %7 = math.exp %6 : vector<1x128xf32>
    %cst_2 = arith.constant 1.000000e-01 : f32
    %8 = vector.broadcast %cst_2 : f32 to vector<1x128xf32>
    %9 = arith.mulf %8, %7 : vector<1x128xf32>
    %10 = arith.addf %4, %9 : vector<1x128xf32>
    %11 = vector.extract_strided_slice %0 {offsets = [1, 0], sizes = [9, 128], strides = [1, 1]} : vector<10x128xf32> to vector<9x128xf32>
    %cst_3 = arith.constant 1.000000e+00 : f32
    %12 = vector.broadcast %cst_3 : f32 to vector<9x128xf32>
    %13 = arith.subf %11, %12 : vector<9x128xf32>
    %14 = arith.mulf %13, %13 : vector<9x128xf32>
    %15 = arith.mulf %14, %14 : vector<9x128xf32>
    %cst_4 = arith.constant dense<0.000000e+00> : vector<128xf32>
    %16 = vector.multi_reduction <add>, %15, %cst_4 [0] : vector<9x128xf32> to vector<128xf32>
    %17 = vector.shape_cast %16 : vector<128xf32> to vector<1x128xf32>
    %18 = arith.addf %10, %17 : vector<1x128xf32>
    %c0_5 = arith.constant 0 : index
    %c0_6 = arith.constant 0 : index
    %19 = vector.load %arg2[%c0_5, %c0_6] : memref<1x128xf32, #tpu.memory_space<vmem>>, vector<1x128xf32>
    tpu.vector_store %arg2[%c0_5, %c0_6], %18 {strides = array<i32>} : memref<1x128xf32, #tpu.memory_space<vmem>>, vector<1x128xf32>,
    return
  }
  func.func @transform_0(%arg0: i32) -> (i32, i32) {
    %c0_i32 = arith.constant 0 : i32
    %c0_i32_0 = arith.constant 0 : i32
    return %c0_i32, %arg0 : i32, i32
  }
  func.func @transform_1(%arg0: i32) -> (i32, i32) {
    %c0_i32 = arith.constant 0 : i32
    %c0_i32_0 = arith.constant 0 : i32
    return %c0_i32, %arg0 : i32, i32
  }
}

</mosaic_0001>

<bundles_post_ra>
// kernel: tpu_custom_call.1
= control target key start
LH: loop header
LB: loop body
LE: loop exit
PB: predicated region body
PF: predicated region fallthrough
CT: control target
= control target key end

     0   :  { %6 = vsyncpa [#allocation3], 0  ;;  %s146_s0 = inlined_call_operand.hbm [shape: f32[10,128], index: 0, kind: input, shape index: {}]   ;;  %s147_s1 = inlined_call_operand.hbm [shape: f32[1,128], index: 1, kind: output, shape index: {}]  }
   0x1   :  { %7 = vsyncpa [#allocation4], 0  ;;  %s126_s6 = smov [#allocation2]  }
   0x2   :  { %s13_s7 = sshll.u32 %s126_s6, 4  ;;  %s14_s7 = int_to_ptr.vmem [resolvable:$true] %s13_s7 }
   0x3   :  { %s90_s8 = scalar_lea.vmem %s14_s7, 256  ;;  %p95_p1 = scmp.lt.s32.totalorder %s14_s7, %s14_s7 }
   0x4   :  { %p91_p0 = scmp.ne.s32.totalorder %s14_s7, %s90_s8  ;;  %p96_p2 = scmp.lt.s32.totalorder %s90_s8, %s90_s8 }
   0x6   :  { %p97_p3 = por %p96_p2, %p95_p1 }
   0x8   :  { %p98_p4 = pnand %p97_p3, %p91_p0 }
   0xa   :  { %101 = shalt.err (!%p98_p4)
}
   0xb   :  { %s127_s9 = smov 128   ;;  %s128_s10 = smov 8  }
   0xc   :  { %19 = dma.hbm_to_vmem [thread:$0]  %s146_s0, 256, %s14_s7, [#allocation3], %s127_s9, %s127_s9, %s128_s10  }
   0xd   :  { %122 = dma.done.wait [#allocation3], 256  }
   0xe   :  { %123 = vsyncadd [#allocation3], 4294967040  ;;  %v23_v0 = vld [vmem:[#allocation2] sm:$0xff]  ;;  %v24_v1 = vld [vmem:[#allocation2 + $0x8] sm:$0x3]  ;;  %vm40_vm0 = vcmask 1046528  }
   0xf   :  { %v25_v2 = vmul.f32 0.5, %v23_v0  ;;  %v27_v3 = vsub.f32 0.0, %v23_v0  ;;  %v72_v4 = vadd.f32 -1.0, %v23_v0  ;;  %v73_v5 = vadd.f32 -1.0, %v24_v1  ;;  %s129_s0 = smov [#allocation5]  }
  0x10   :  { %vm46_vm1 = vcmask 1040384   ;;  %s63_s13 = sshll.u32 %s129_s0, 4  ;;  %s64_s13 = int_to_ptr.vmem [resolvable:$true] %s63_s13 }
  0x11   :  { %v28_v6 = vmul.f32 1.442695, %v27_v3  ;;  %v34_v7 = vmul.f32 %v72_v4, %v72_v4  ;;  %v35_v8 = vmul.f32 %v73_v5, %v73_v5  ;;  %78 = vtanh.f32 %v25_v2  ;;  %s102_s14 = scalar_lea.vmem %s64_s13, 16  ;;  %s106_s15 = scalar_lea.vmem %s64_s13, 32 }
  0x12   :  { %p103_p5 = scmp.ne.s32.totalorder %s64_s13, %s102_s14  ;;  %p107_p6 = scmp.lt.s32.totalorder %s64_s13, %s64_s13 }
  0x13   :  { %80 = vpow2.f32 %v28_v6  ;;  %v36_v9 = vmul.f32 %v34_v7, %v34_v7  ;;  %v37_v10 = vmul.f32 %v35_v8, %v35_v8  ;;  %p108_p7 = scmp.lt.s32.totalorder %s106_s15, %s102_s14 }
  0x15   :  { %v41_v11 = vrot.slane %v36_v9, 1  ;;  %v42_v12 = vrot.slane %v37_v10, 1  ;;  %p109_p8 = por %p108_p7, %p107_p6 }
  0x17   :  { %v43_v13 = vsel %vm40_vm0, %v41_v11, %v42_v12  ;;  %v47_v14 = vsel %vm46_vm1, %v42_v12, 0.0  ;;  %p110_p9 = pnand %p109_p8, %p103_p5 }
  0x18   :  { %v48_v15 = vadd.f32 %v47_v14, %v43_v13 }
  0x1a   :  { %v49_v16 = vrot.slane %v48_v15, 4 }
  0x1c   :  { %v50_v17 = vadd.f32 %v49_v16, %v48_v15 }
  0x1e   :  { %v51_v18 = vrot.slane %v50_v17, 2  ;;  %v79_v19 = vpop.eup %78 }
  0x20   :  { %v81_v20 = vpop.eup %80  ;;  %v52_v21 = vadd.f32 %v51_v18, %v50_v17 }
  0x21   :  { %v30_v22 = vmul.f32 0.1, %v81_v20 }
  0x22   :  { %v53_v23 = vrot.slane %v52_v21, 1 }
  0x23   :  { %v31_v24 = vadd.f32 %v79_v19, %v30_v22 }
  0x24   :  { %v54_v25 = vadd.f32 %v53_v23, %v52_v21 }
  0x26   :  { %v55_v26 = vadd.f32 %v54_v25, %v31_v24 }
  0x28   :  { %56 = vst [vmem:[#allocation5] sm:$0x1] %v55_v26 }
  0x29   :  { %113 = shalt.err (!%p110_p9)
}
  0x2a   :  { %66 = dma.vmem_to_hbm [thread:$0]  %s64_s13, 16, %s147_s1, [#allocation4]  }
  0x2b   :  { %124 = dma.done.wait [#allocation4], 16  }
  0x2c   :  { %125 = vsyncadd [#allocation4], 4294967280 }
  0x2d   :  { %70 = vsyncpa [#allocation3], 1 }
  0x2e   :  { %71 = vsyncpa [#allocation4], 1 }

</bundles_post_ra>
